<compile_context>
chip_gen: v7x
topology: tpu7x:2x2x1
jax: 0.10.0
libtpu: 0.0.40
codegen_flags: <defaults>
</compile_context>

<pallas_src>
import random

import numpy as np
import jax
import jax.numpy as jnp
from jax.experimental import pallas as pl
from jax.experimental.pallas import tpu as pltpu


# ----------------------------------------------------------------------------
# padding helpers
# ----------------------------------------------------------------------------
def _pad8(n):
    return -(-n // 8) * 8


def _pad128(n):
    return -(-n // 128) * 128


def _embed(m, rows, cols):
    """Embed (r0,c0) matrix into a zero (rows,cols) matrix (top-left corner)."""
    out = np.zeros((rows, cols), np.float32)
    out[: m.shape[0], : m.shape[1]] = m
    return out


# ----------------------------------------------------------------------------
# Pallas kernel: per-channel  O = A @ X @ B^T  with fused epilogue
# ----------------------------------------------------------------------------
def _make_sandwich_kernel(ax_first, epilogue, scale):
    def kernel(a_ref, x_ref, bt_ref, o_ref, acc_ref):
        a, x, bt = a_ref[...], x_ref[...], bt_ref[...]
        if ax_first:
            acc_ref[...] = jnp.dot(a, x, preferred_element_type=jnp.float32)
            out = jnp.dot(acc_ref[...].astype(bt.dtype), bt,
                          preferred_element_type=jnp.float32)
        else:
            acc_ref[...] = jnp.dot(x, bt, preferred_element_type=jnp.float32)
            out = jnp.dot(a, acc_ref[...].astype(a.dtype),
                          preferred_element_type=jnp.float32)
        if epilogue == 'u8q':          # PIL-style uint8 store: round + clip
            out = jnp.clip(jnp.round(out), 0.0, 255.0)
        elif epilogue == 'scale':      # mask /255 (factored out of 0/1 weights)
            out = out * scale
        o_ref[...] = out.astype(o_ref.dtype)
    return kernel


def sandwich(x_chw, a_np, bt_np, *, chan_start=0, num_chan=None,
             epilogue=None, scale=1.0, compute_dtype=jnp.float32):
    """out[c] = epilogue(a @ x_chw[chan_start + c] @ bt)   (a:(Ho,Hi), bt:(Wi,Wo))."""
    c_total, hi, wi = x_chw.shape
    if num_chan is None:
        num_chan = c_total - chan_start
    ho, wo = a_np.shape[0], bt_np.shape[1]
    assert a_np.shape[1] == hi and bt_np.shape[0] == wi

    # pick contraction order: minimize MXU MACs and tmp size (static decision)
    cost_ax = ho * hi * wi + ho * wi * wo      # (A@X)@BT
    cost_xb = hi * wi * wo + ho * hi * wo      # A@(X@BT)
    ax_first = cost_ax <= cost_xb
    acc_shape = (ho, wi) if ax_first else (hi, wo)

    kernel = _make_sandwich_kernel(ax_first, epilogue, scale)
    a = jnp.asarray(a_np, compute_dtype)
    bt = jnp.asarray(bt_np, compute_dtype)
    x = x_chw if x_chw.dtype == compute_dtype else x_chw.astype(compute_dtype)

    # NOTE: A / BT index_maps are constant across the (tiny) channel grid; they
    # could be single-buffered (pl.Buffered(1)) but defaults are kept for
    # portability — VMEM is nowhere near a constraint at these sizes.
    return pl.pallas_call(
        kernel,
        out_shape=jax.ShapeDtypeStruct((num_chan, ho, wo), jnp.float32),
        grid=(num_chan,),
        in_specs=[
            pl.BlockSpec((ho, hi), lambda i: (0, 0)),
            pl.BlockSpec((None, hi, wi), lambda i: (i + chan_start, 0, 0)),
            pl.BlockSpec((wi, wo), lambda i: (0, 0)),
        ],
        out_specs=pl.BlockSpec((None, ho, wo), lambda i: (i, 0, 0)),
        scratch_shapes=[pltpu.VMEM(acc_shape, jnp.float32)],
        compiler_params=pltpu.CompilerParams(dimension_semantics=("parallel",)),
    )(a, x, bt)


# ----------------------------------------------------------------------------
# Interpolation / selection / placement matrices (host-side numpy)
# ----------------------------------------------------------------------------
def bilinear_matrix(out_size, in_size):
    # TODO(synk): PIL widens the filter support (antialias) when downscaling;
    # approximated here with plain (non-antialiased) bilinear weights.
    scale = in_size / out_size
    d = np.arange(out_size)
    src = np.clip((d + 0.5) * scale - 0.5, 0.0, in_size - 1)
    i0 = np.floor(src).astype(np.int64)
    i1 = np.minimum(i0 + 1, in_size - 1)
    w1 = (src - i0).astype(np.float32)
    w0 = 1.0 - w1
    m = np.zeros((out_size, in_size), np.float32)
    np.add.at(m, (d, i0), w0)
    np.add.at(m, (d, i1), w1)
    return m


def nearest_indices(out_size, in_size):
    scale = in_size / out_size
    d = np.arange(out_size)
    return np.clip(np.floor((d + 0.5) * scale), 0, in_size - 1).astype(np.int64)


def nearest_matrix(out_size, in_size):
    m = np.zeros((out_size, in_size), np.float32)
    m[np.arange(out_size), nearest_indices(out_size, in_size)] = 1.0
    return m


def crop_matrix(out_size, in_size, start):
    m = np.zeros((out_size, in_size), np.float32)
    m[np.arange(out_size), start + np.arange(out_size)] = 1.0
    return m


def place_matrix(out_size, in_size, start):
    m = np.zeros((out_size, in_size), np.float32)
    m[start + np.arange(in_size), np.arange(in_size)] = 1.0
    return m


def _tv_resize_hw(h, w, size, max_size=None):
    """torchvision F.resize(size=int) output (h, w): shorter edge -> size."""
    short, long = (h, w) if h <= w else (w, h)
    new_short = size
    new_long = int(size * long / short)
    if max_size is not None and new_long > max_size:
        new_short = int(max_size * new_short / new_long)
        new_long = max_size
    return (new_short, new_long) if h <= w else (new_long, new_short)


# ----------------------------------------------------------------------------
# ResizeFillMaskNew forward
# ----------------------------------------------------------------------------
class ResizeFillMaskNewPallas:
    def __init__(self, size, crop_p, scale_ratio, seed=0):
        self.size = size
        self.crop_p = crop_p
        self.scale_ratio = scale_ratio
        self.rng = random.Random(seed)   # mirrors host-side `random` of the module

    def __call__(self, img_hwc_u8, **kwargs):
        size, rng = self.size, self.rng
        has_mask = 'mask' in kwargs
        h0, w0, _ = img_hwc_u8.shape

        # TODO(synk): HWC->CHW transpose and u8->f32 cast stay as (tiny) XLA ops;
        # folding them into the first kernel would need a strided-lane load.
        img_chw = jnp.transpose(img_hwc_u8.astype(jnp.float32), (2, 0, 1))
        if has_mask:
            x0 = jnp.concatenate(
                [img_chw, kwargs['mask'].astype(jnp.float32)[None]], axis=0)
        else:
            x0 = img_chw
        n_chan = x0.shape[0]

        # --- stage 1: F.resize(img/mask, size)  (shorter edge -> size, bilinear)
        # img + mask stacked on the channel grid: one call instead of two.
        h1, w1 = _tv_resize_hw(h0, w0, size)
        h1p, w1p = _pad8(h1), _pad128(w1)
        a1 = _embed(bilinear_matrix(h1, h0), h1p, h0)
        bt1 = _embed(bilinear_matrix(w1, w0).T, w0, w1p)
        cur = sandwich(x0, a1, bt1, epilogue='u8q')     # (C, h1p, w1p), u8-valued

        # --- stage 2: random crop  OR  resize(size-1, max_size=size)
        if rng.random() < self.crop_p:
            assert h1 >= size and w1 >= size
            x = rng.randint(0, w1 - size)
            y = rng.randint(0, h1 - size)
            h2, w2 = size, size
            # crop is an exact selection on u8 values -> composed into the tails
            to_h2 = _embed(crop_matrix(size, h1, y), size, h1p)     # (h2, h1p)
            to_w2 = _embed(crop_matrix(size, w1, x), size, w1p)     # (w2, w1p)
        else:
            h2, w2 = _tv_resize_hw(h1, w1, size - 1, max_size=size)
            h2p, w2p = _pad8(h2), _pad128(w2)
            a2 = _embed(bilinear_matrix(h2, h1), h2p, h1p)
            bt2 = _embed(bilinear_matrix(w2, w1).T, w1p, w2p)
            cur = sandwich(cur, a2, bt2, epilogue='u8q')            # (C, h2p, w2p)
            to_h2 = np.eye(h2, h2p, dtype=np.float32)
            to_w2 = np.eye(w2, w2p, dtype=np.float32)

        hi_cur, wi_cur = cur.shape[1], cur.shape[2]

        # --- stages 3+4(+5) composed on the host into single sandwiches -------
        ratio = rng.uniform(*self.scale_ratio)
        new_h, new_w = int(h2 * ratio), int(w2 * ratio)
        # TODO(synk): reference hardcodes 512 (assumes size==512) for the paste
        # range; we use `size` so small demo sizes also work.
        start_y = rng.randint(0, size - new_h)
        start_x = rng.randint(0, size - new_w)

        a_place = place_matrix(size, new_h, start_y)
        b_place = place_matrix(size, new_w, start_x)
        size_p8, size_p128 = _pad8(size), _pad128(size)

        # img: bilinear scale -> paste, final u8 round/clip fused in the epilogue
        # (the intermediate u8q after stage 3 is mathematically redundant given
        #  paste only relocates values and the final quantize re-applies it).
        a_img = _embed(a_place @ bilinear_matrix(new_h, h2) @ to_h2,
                       size_p8, hi_cur)
        bt_img = _embed((b_place @ bilinear_matrix(new_w, w2) @ to_w2).T,
                        wi_cur, size_p128)
        res_img = sandwich(cur, a_img, bt_img, chan_start=0, num_chan=3,
                           epilogue='u8q')              # (3, size_p8, size_p128)
        out_img = jnp.transpose(res_img[:, :size, :size], (1, 2, 0)).astype(jnp.uint8)

        out_kwargs = dict(kwargs)
        s8 = size // 8

        if has_mask:
            # mask: nearest scale -> /255 -> paste -> s8 nearest downsample,
            # all composed into ONE tiny sandwich straight to (s8, s8).
            # Composed weights are exactly 0/1 and values <=255 -> bf16 exact.
            # TODO(synk): reference passes cv2.INTER_NEAREST positionally as
            # `dst` (a bug); we follow the evident intent (nearest-neighbour).
            s8p8, s8p128 = _pad8(s8), _pad128(s8)
            a_mask = _embed(nearest_matrix(s8, size) @ a_place
                            @ nearest_matrix(new_h, h2) @ to_h2,
                            s8p8, hi_cur)
            bt_mask = _embed((nearest_matrix(s8, size) @ b_place
                              @ nearest_matrix(new_w, w2) @ to_w2).T,
                             wi_cur, s8p128)
            res_mask = sandwich(cur, a_mask, bt_mask,
                                chan_start=n_chan - 1, num_chan=1,
                                epilogue='scale', scale=1.0 / 255.0,
                                compute_dtype=jnp.bfloat16)
            out_kwargs['mask'] = res_mask[0, :s8, :s8]   # f32 (reference: float64)

        # img_mask is fully determined by static offsets -> pure host numpy,
        # no device work, no kernel launches.
        im = np.zeros((size, size), np.float32)
        im[start_y:start_y + new_h, start_x:start_x + new_w] = 1.0
        ri = nearest_indices(s8, size)
        ci = nearest_indices(s8, size)
        out_kwargs['img_mask'] = jnp.asarray(im[np.ix_(ri, ci)])

        return out_img, out_kwargs


# ----------------------------------------------------------------------------
if __name__ == "__main__":
    key = jax.random.PRNGKey(0)
    k1, k2 = jax.random.split(key)

    H0, W0 = 80, 96
    img = jax.random.randint(k1, (H0, W0, 3), 0, 256, dtype=jnp.int32).astype(jnp.uint8)
    mask = (jax.random.randint(k2, (H0, W0), 0, 2, dtype=jnp.int32) * 255).astype(jnp.uint8)

    transform = ResizeFillMaskNewPallas(size=64, crop_p=0.5,
                                        scale_ratio=(0.75, 1.0), seed=0)
    out_img, out_kwargs = transform(img, mask=mask)

    jax.block_until_ready((out_img, out_kwargs['mask'], out_kwargs['img_mask']))
    assert out_img.shape == (64, 64, 3) and out_img.dtype == jnp.uint8
    assert out_kwargs['mask'].shape == (8, 8)
    assert out_kwargs['img_mask'].shape == (8, 8)
    print("KERNEL_OK")
</pallas_src>

<mosaic_0001>
module attributes {stable_mosaic.version = 11 : i64} {
  func.func @kernel(%arg0: i32, %arg1: memref<64x80xf32, #tpu.memory_space<vmem>>, %arg2: memref<1x80x96xf32, #tpu.memory_space<vmem>>, %arg3: memref<96x128xf32, #tpu.memory_space<vmem>>, %arg4: memref<1x64x128xf32, #tpu.memory_space<vmem>>, %arg5: memref<64x96xf32, #tpu.memory_space<vmem>>) attributes {dimension_semantics = [#tpu.dimension_semantics<parallel>], iteration_bounds = array<i64: 4>, scalar_prefetch = 0 : i64, scratch_operands = 1 : i64, tpu.core_type = #tpu.core_type<tc>, window_params = [{pipeline_mode = #tpu.pipeline_mode<synchronous>, transform_indices = @transform_0, window_bounds = array<i64: 64, 80>}, {transform_indices = @transform_1, window_bounds = array<i64: 1, 80, 96>}, {pipeline_mode = #tpu.pipeline_mode<synchronous>, transform_indices = @transform_2, window_bounds = array<i64: 96, 128>}, {transform_indices = @transform_3, window_bounds = array<i64: 1, 64, 128>}]} {
    %c0 = arith.constant 0 : index
    %c0_0 = arith.constant 0 : index
    %0 = vector.load %arg1[%c0, %c0_0] : memref<64x80xf32, #tpu.memory_space<vmem>>, vector<64x80xf32>
    %c0_1 = arith.constant 0 : index
    %c0_2 = arith.constant 0 : index
    %c0_3 = arith.constant 0 : index
    %1 = vector.load %arg2[%c0_1, %c0_2, %c0_3] : memref<1x80x96xf32, #tpu.memory_space<vmem>>, vector<1x80x96xf32>
    %2 = vector.shape_cast %1 : vector<1x80x96xf32> to vector<80x96xf32>
    %c0_4 = arith.constant 0 : index
    %c0_5 = arith.constant 0 : index
    %3 = vector.load %arg3[%c0_4, %c0_5] : memref<96x128xf32, #tpu.memory_space<vmem>>, vector<96x128xf32>
    %cst = arith.constant dense<0.000000e+00> : vector<64x96xf32>
    %4 = tpu.matmul %0, %2, %cst {dimension_numbers = #tpu.dot_dimension_numbers<[1], [0], [0], [1], [0, 0, 1, 1], [], []>} : vector<64x80xf32>, vector<80x96xf32>, vector<64x96xf32> -> vector<64x96xf32>
    %c0_6 = arith.constant 0 : index
    %c0_7 = arith.constant 0 : index
    %5 = vector.load %arg5[%c0_6, %c0_7] : memref<64x96xf32, #tpu.memory_space<vmem>>, vector<64x96xf32>
    tpu.vector_store %arg5[%c0_6, %c0_7], %4 {strides = array<i32>} : memref<64x96xf32, #tpu.memory_space<vmem>>, vector<64x96xf32>,
    %c0_8 = arith.constant 0 : index
    %c0_9 = arith.constant 0 : index
    %6 = vector.load %arg5[%c0_8, %c0_9] : memref<64x96xf32, #tpu.memory_space<vmem>>, vector<64x96xf32>
    %cst_10 = arith.constant dense<0.000000e+00> : vector<64x128xf32>
    %7 = tpu.matmul %6, %3, %cst_10 {dimension_numbers = #tpu.dot_dimension_numbers<[1], [0], [0], [1], [0, 0, 1, 1], [], []>} : vector<64x96xf32>, vector<96x128xf32>, vector<64x128xf32> -> vector<64x128xf32>
    %8 = math.roundeven %7 : vector<64x128xf32>
    %cst_11 = arith.constant 0.000000e+00 : f32
    %cst_12 = arith.constant 2.550000e+02 : f32
    %9 = vector.broadcast %cst_11 : f32 to vector<64x128xf32>
    %10 = arith.maximumf %9, %8 : vector<64x128xf32>
    %11 = vector.broadcast %cst_12 : f32 to vector<64x128xf32>
    %12 = arith.minimumf %11, %10 : vector<64x128xf32>
    %c0_13 = arith.constant 0 : index
    %c0_14 = arith.constant 0 : index
    %c0_15 = arith.constant 0 : index
    %13 = vector.load %arg4[%c0_13, %c0_14, %c0_15] : memref<1x64x128xf32, #tpu.memory_space<vmem>>, vector<1x64x128xf32>
    %14 = vector.shape_cast %13 : vector<1x64x128xf32> to vector<64x128xf32>
    %15 = vector.shape_cast %12 : vector<64x128xf32> to vector<1x64x128xf32>
    tpu.vector_store %arg4[%c0_13, %c0_14, %c0_15], %15 {strides = array<i32>} : memref<1x64x128xf32, #tpu.memory_space<vmem>>, vector<1x64x128xf32>,
    return
  }
  func.func @transform_0(%arg0: i32) -> (i32, i32) {
    %c0_i32 = arith.constant 0 : i32
    %c0_i32_0 = arith.constant 0 : i32
    %c0_i32_1 = arith.constant 0 : i32
    return %c0_i32, %c0_i32_0 : i32, i32
  }
  func.func @transform_1(%arg0: i32) -> (i32, i32, i32) {
    %c0_i32 = arith.constant 0 : i32
    %0 = arith.addi %arg0, %c0_i32 : i32
    %c0_i32_0 = arith.constant 0 : i32
    %c0_i32_1 = arith.constant 0 : i32
    %c0_i32_2 = arith.constant 0 : i32
    return %0, %c0_i32_0, %c0_i32_1 : i32, i32, i32
  }
  func.func @transform_2(%arg0: i32) -> (i32, i32) {
    %c0_i32 = arith.constant 0 : i32
    %c0_i32_0 = arith.constant 0 : i32
    %c0_i32_1 = arith.constant 0 : i32
    return %c0_i32, %c0_i32_0 : i32, i32
  }
  func.func @transform_3(%arg0: i32) -> (i32, i32, i32) {
    %c0_i32 = arith.constant 0 : i32
    %c0_i32_0 = arith.constant 0 : i32
    %c0_i32_1 = arith.constant 0 : i32
    return %arg0, %c0_i32, %c0_i32_0 : i32, i32, i32
  }
}

</mosaic_0001>

<bundles_post_ra>
// kernel: tpu_custom_call.1
= control target key start
LH: loop header
LB: loop body
LE: loop exit
PB: predicated region body
PF: predicated region fallthrough
CT: control target
= control target key end

     0   :  { %8 = vsyncpa [#allocation4], 0  ;;  %s1404_s0 = inlined_call_operand.hbm [shape: f32[64,80], index: 0, kind: input, shape index: {}]   ;;  %s1405_s1 = inlined_call_operand.hbm [shape: f32[4,80,96], index: 1, kind: input, shape index: {}]   ;;  %s1406_s2 = inlined_call_operand.hbm [shape: f32[96,128], index: 2, kind: input, shape index: {}]   ;;  %s1407_s3 = inlined_call_operand.hbm [shape: f32[4,64,128], index: 3, kind: output, shape index: {}]  }
   0x1   :  { %9 = vsyncpa [#allocation7], 0 }
   0x2   :  { %11 = vsyncpa [#allocation7 + $0x1], 0 }
   0x3   :  { %12 = vsyncpa [#allocation5], 0 }
   0x4   :  { %14 = vsyncpa [#allocation5 + $0x1], 0  ;;  %s1118_s12 = smov 0   ;;  %s1120_s13 = smov 0  }
   0x5   :  { %s1122_s14 = smov 0   ;;  %s1124_s15 = smov 0  }
   0x6 LB: > { %s1139_s16 = sadd.s32 4294967295, %s1088_s15   ;;  %s664_s17 = sadd.s32 4294967294, %s1088_s15   ;;  %s1088_s15 = sphi %s1124_s15, %s1434_s15   ;;  %s1084_s14 = sphi %s1122_s14, %s1433_s14   ;;  %s1080_s13 = sphi %s1120_s13, %s1432_s13   ;;  %s1076_s12 = sphi %s1118_s12, %s1431_s12  }
   0x7   : > { %s1143_s18 = sadd.s32 1, %s1088_s15   ;;  %s48_s19 = sadd.s32 1, %s1084_s14 }
   0x8   : > { %s45_s20 = ssub.s32 %s1088_s15, %s1143_s18  ;;  %p55_p0 = scmp.ne.s32.totalorder %s1084_s14, %s1080_s13 }
   0x9   : > { %p46_p1 = scmp.eq.s32.totalorder %s45_s20, 0  ;;  %p56_p2 = scmp.eq.s32.totalorder %s1088_s15, 0 }
   0xa   : > { %p61_p3 = scmp.ne.s32.totalorder %s1080_s13, %s1076_s12  ;;  %p1408_p4 = scmp.eq.s32.totalorder %s1139_s16, 0 }
   0xb   : > { %s1155_s21 = scalar_select %p46_p1, %s1084_s14, %s48_s19  }
   0xc   : > { %p1157_p5 = por %p56_p2, %p55_p0  ;;  %p1163_p6 = por %p1408_p4, %p61_p3 }
   0xd   : > { %p106_p7 = scmp.eq.s32.totalorder %s1139_s16, 3  ;;  %p112_p8 = scmp.eq.s32.totalorder %s664_s17, 3 }
   0xe   : > { %s1413_s22 = scalar_select %p1157_p5, 1, 0 }
   0xf   : > { %s1414_s23 = scalar_select %p1163_p6, 1, 0 }
  0x10   : > { %p665_p9 = scmp.ge.s32.totalorder %s1088_s15, 1  ;;  %p119_p10 = scmp.lt.s32.totalorder %s1088_s15, 5 }
  0x11   : > { %p1170_p11 = por %p106_p7, %p55_p0  ;;  %p1174_p12 = por %p112_p8, %p61_p3 }
  0x12   : > { %p1178_p13 = pnand %p665_p9, %p119_p10  ;;  %s1090_s27 = smov [#allocation8]  }
  0x13   : > { %s1415_s24 = scalar_select %p1170_p11, 1, 0 }
  0x14   : > { %s1416_s25 = scalar_select %p1174_p12, 1, 0 }
  0x15   : > { %s1417_s26 = scalar_select %p1178_p13, 1, 0 }
  0x16   : > { %p869_p1 = pneg %p1178_p13  ;;  %s144_s28 = sshll.u32 %s1090_s27, 4  ;;  %s145_s28 = int_to_ptr.vmem [resolvable:$true] %s144_s28 }
  0x17   : > { %s1091_s30 = smov [#allocation3]   ;;  %s928_s7 = scalar_lea.hbm %s1406_s2, 1536 }
  0x18   : > { %p1186_p2 = pnand %p869_p1, %p1408_p4  ;;  %s131_s4 = sshll.u32 %s1091_s30, 4  ;;  %s132_s4 = int_to_ptr.vmem [resolvable:$true] %s131_s4 }
  0x19   : > { %p929_p3 = scmp.ne.s32.totalorder %s1406_s2, %s928_s7  ;;  %p935_p10 = scmp.lt.u32.totalorder %s928_s7, %s1406_s2 }
  0x1a   : > { %p930_p7 = pneg %p1186_p2 }
  0x1c   : > { %p931_p8 = pnand %p930_p7, %p929_p3 }
  0x1e   : > { %p932_p9 = pneg %p931_p8 }
  0x20   : > { %p937_p1 = pnand %p935_p10, %p932_p9 }
  0x22   : > { %940 = shalt.err (!%p937_p1)
}
  0x23   : > { %s941_s17 = scalar_lea.vmem %s145_s28, 1536  ;;  %p949_p11 = scmp.lt.s32.totalorder %s145_s28, %s145_s28 }
  0x24   : > { %p942_p4 = scmp.ne.s32.totalorder %s145_s28, %s941_s17  ;;  %p950_p6 = scmp.lt.s32.totalorder %s941_s17, %s941_s17 }
  0x26   : > { %p944_p0 = pnand %p942_p4, %p930_p7  ;;  %p951_p13 = por %p950_p6, %p949_p11 }
  0x28   : > { %p945_p12 = pneg %p944_p0 }
  0x2a   : > { %p952_p5 = pnand %p951_p13, %p945_p12 }
  0x2c   : > { %955 = shalt.err (!%p952_p5)
}
  0x2d   : > { %s1092_s19 = smov 128   ;;  %s1093_s20 = smov 8  }
  0x2e   : > { %875 = dma.hbm_to_vmem [thread:$0]  (!%p1186_p2), %s1406_s2, 1536, %s145_s28, [#allocation7], %s1092_s19, %s1092_s19, %s1093_s20  }
  0x2f   : > { %p1419_p4 = scmp.ne.s32.totalorder %s1413_s22, 0  ;;  %p1420_p0 = scmp.lt.s32.totalorder %s1088_s15, 4 }
  0x30   : > { %s956_s8 = scalar_lea.hbm %s1404_s0, 1024 }
  0x31   : > { %p1220_p3 = pnand %p1420_p0, %p1419_p4  ;;  %p957_p5 = scmp.ne.s32.totalorder %s1404_s0, %s956_s8 }
  0x32   : > { %p963_p12 = scmp.lt.u32.totalorder %s956_s8, %s1404_s0 }
  0x33   : > { %s1421_s5 = scalar_select %p1220_p3, 1, 0 }
  0x34   : > { %p959_p6 = pnand %p957_p5, %p930_p7 }
  0x36   : > { %p960_p11 = pneg %p959_p6 }
  0x38   : > { %p965_p13 = pnand %p963_p12, %p960_p11 }
  0x3a   : > { %968 = shalt.err (!%p965_p13)
}
  0x3b   : > { %s969_s11 = scalar_lea.vmem %s132_s4, 1024  ;;  %p977_p1 = scmp.lt.s32.totalorder %s132_s4, %s132_s4 }
  0x3c   : > { %p970_p8 = scmp.ne.s32.totalorder %s132_s4, %s969_s11  ;;  %p978_p4 = scmp.lt.s32.totalorder %s969_s11, %s969_s11 }
  0x3e   : > { %p972_p9 = pnand %p970_p8, %p930_p7  ;;  %p979_p0 = por %p978_p4, %p977_p1 }
  0x40   : > { %p973_p10 = pneg %p972_p9 }
  0x42   : > { %p980_p3 = pnand %p979_p0, %p973_p10 }
  0x44   : > { %983 = shalt.err (!%p980_p3)
}
  0x45   : > { %872 = dma.hbm_to_vmem [thread:$0]  (!%p1186_p2), %s1404_s0, 1024, %s132_s4, [#allocation4], %s1092_s19, %s1092_s19, %s1093_s20  }
  0x46   : > { %s158_s30 = sand.u32 1, %s1088_s15   ;;  %s160_s6 = sand.u32 1, %s1084_s14  }
  0x47   : > { %s846_s7 = smul.u32 80, %s160_s6  ;;  %s1257_s11 = scalar_lea.sflag [#allocation7], %s158_s30 }
  0x48   : > { %s847_s8 = smul.u32 1280, %s1088_s15  ;;  %p1422_p7 = scmp.ne.s32.totalorder %s1421_s5, 0 }
  0x49   : > { %s162_s28 = scalar_lea.vmem [#allocation6], %s846_s7  ;;  %s989_s6 = scalar_lea.hbm %s1405_s1, 5120 }
  0x4a   : > { %s1253_s29 = scalar_lea.hbm %s1405_s1, %s847_s8  ;;  %s169_s22 = sshll.u32 %s162_s28, 4  ;;  %s1255_s22 = int_to_ptr.vmem [resolvable:$true] %s169_s22 }
  0x4b   : > { %s984_s4 = scalar_lea.hbm %s1253_s29, 1280  ;;  %p986_p3 = pneg %p1422_p7 }
  0x4c   : > { %p985_p2 = scmp.ne.s32.totalorder %s1253_s29, %s984_s4  ;;  %p990_p11 = scmp.lt.u32.totalorder %s1253_s29, %s1405_s1 }
  0x4d   : > { %p991_p12 = scmp.lt.u32.totalorder %s989_s6, %s984_s4  ;;  %p993_p8 = scmp.lt.u32.totalorder %s984_s4, %s1253_s29 }
  0x4e   : > { %p987_p5 = pnand %p986_p3, %p985_p2 }
  0x4f   : > { %p992_p13 = por %p991_p12, %p990_p11 }
  0x50   : > { %p988_p6 = pneg %p987_p5 }
  0x51   : > { %p994_p9 = por %p993_p8, %p992_p13 }
  0x53   : > { %p995_p10 = pnand %p994_p9, %p988_p6 }
  0x55   : > { %998 = shalt.err (!%p995_p10)
}
  0x56   : > { %s999_s30 = scalar_lea.vmem %s1255_s22, 1280  ;;  %s1094_s7 = smov [#allocation6]  }
  0x57   : > { %p1000_p1 = scmp.ne.s32.totalorder %s1255_s22, %s999_s30  ;;  %s1004_s10 = sshll.u32 %s1094_s7, 4  ;;  %s1005_s10 = int_to_ptr.vmem [resolvable:$false] %s1004_s10 }
  0x58   : > { %s1006_s28 = scalar_lea.vmem %s1005_s10, 2560  ;;  %p1007_p2 = scmp.lt.s32.totalorder %s1255_s22, %s1005_s10 }
  0x59   : > { %p1002_p4 = pnand %p1000_p1, %p986_p3  ;;  %p1008_p5 = scmp.lt.s32.totalorder %s1006_s28, %s999_s30 }
  0x5b   : > { %p1003_p0 = pneg %p1002_p4  ;;  %p1009_p11 = por %p1008_p5, %p1007_p2 }
  0x5d   : > { %p1010_p12 = pnand %p1009_p11, %p1003_p0 }
  0x5f   : > { %1013 = shalt.err (!%p1010_p12)
}
  0x60   : > { %879 = dma.hbm_to_vmem [thread:$0]  (!%p1422_p7), %s1253_s29, 1280, %s1255_s22, %s1257_s11, %s1092_s19, %s1092_s19, %s1093_s20  }
  0x61   : > { %p1423_p3 = scmp.ne.s32.totalorder %s1417_s26, 0 }
  0x62   : > { %p1424_p6 = scmp.eq.s32.totalorder (!%p1423_p3), %s1139_s16, 0 }
  0x63   : > { %181 = sbr.rel (%p1423_p3) target bundleno = 606 (0x25e), region = 32 }
  0x6a   : > { %1059 = dma.done.wait (%p1424_p6), [#allocation4], 1024   ;;  %p1425_p13 = pmov %p1424_p6 }
  0x6b   : > { %s187_s5 = sand.u32 1, %s1139_s16   ;;  %s1296_s4 = sand.u32 1, %s1080_s13  }
  0x6c   : > { %1061 = vsyncadd (%p1425_p13), [#allocation4], 4294966272  ;;  %s848_s17 = smul.u32 80, %s1296_s4  ;;  %s188_s27 = scalar_lea.sflag [#allocation7], %s187_s5 }
  0x6d   : > { %p1426_p7 = scmp.ne.s32.totalorder %s1414_s23, 0 }
  0x6e   : > { %s1299_s6 = scalar_lea.vmem [#allocation6], %s848_s17 }
  0x6f   : > { %1063 = dma.done.wait (%p1426_p7), %s188_s27, 1280  }
  0x70   : > { %1065 = vsyncadd (%p1426_p7), %s188_s27, 4294966016  ;;  %p1427_p8 = pmov %p1424_p6 }
  0x71   : > { %p1428_p9 = pmov %p1424_p6 }
  0x72   : > { %1067 = dma.done.wait (%p1427_p8), [#allocation7], 1536  }
  0x73   : > { %1069 = vsyncadd (%p1428_p9), [#allocation7], 4294965760  ;;  %v226_v0 = vld [vmem:[%s1299_s6] sm:$0xff]  ;;  %v227_v1 = vld [vmem:[%s1299_s6 + $0x8] sm:$0xff]  ;;  %vm248_vm0 = vcmask 654336   ;;  %vm378_vm1 = vcmask 785408  }
  0x74   : > { %v228_v2 = vld [vmem:[%s1299_s6 + $0x10] sm:$0xff]  ;;  %v802_v3 = vpack.c.bf16 %v227_v1, %v226_v0  ;;  %v229_v4 = vld [vmem:[%s1299_s6 + $0x18] sm:$0xff]  ;;  %v230_v6 = vld [vmem:[%s1299_s6 + $0x20] sm:$0xff]  ;;  %s673_s23 = sshll.u32 %s1296_s4, 6  ;;  %s695_s20 = sshll.u32 %s1139_s16, 10 }
  0x75   : > { %v806_v5 = vpack.c.bf16 %v229_v4, %v228_v2  ;;  %v231_v7 = vld [vmem:[%s1299_s6 + $0x28] sm:$0xff]  ;;  %v218_v8 = vld [vmem:[#allocation3] sm:$0xff]  ;;  %v233_v11 = vld [vmem:[%s1299_s6 + $0x38] sm:$0xff]  ;;  %s1344_s26 = scalar_lea.vmem [#allocation9], %s673_s23  ;;  %s1359_s11 = scalar_lea.hbm %s1407_s3, %s695_s20 }
  0x76   : > { %803 = vmatprep.subr.bf16.mxu0 %v802_v3  ;;  %754 = vmatprep.mubr.msk.f32.mxu0 %vm248_vm0, %v218_v8  ;;  %v810_v9 = vpack.c.bf16 %v231_v7, %v230_v6  ;;  %v232_v10 = vld [vmem:[%s1299_s6 + $0x30] sm:$0xff]  ;;  %v237_v13 = vld [vmem:[#allocation8 + $0x8] sm:$0xff]  ;;  %v239_v16 = vld [vmem:[#allocation8 + $0x18] sm:$0xff]  ;;  %s570_s19 = sshll.u32 %s1344_s26, 4  ;;  %s557_s8 = scalar_lea.sflag [#allocation5], %s1296_s4  ;;  %s1353_s19 = int_to_ptr.vmem [resolvable:$true] %s570_s19 }
  0x77   : > { %805 = vmatpush3.bf16.msra.mxu0 %v802_v3  ;;  %v236_v12 = vld [vmem:[#allocation8] sm:$0xff]  ;;  %v238_v14 = vld [vmem:[#allocation8 + $0x10] sm:$0xff]  ;;  %v241_v19 = vld [vmem:[#allocation8 + $0x28] sm:$0xff]  ;;  %v814_v20 = vpack.c.bf16 %v233_v11, %v232_v10  ;;  %s1014_s16 = scalar_lea.vmem %s1353_s19, 1024  ;;  %p1429_p1 = scmp.ne.s32.totalorder %s1415_s24, 0 }
  0x78   : > { %807 = vmatprep.subr.bf16.mxu0 %v806_v5  ;;  %v822_v15 = vpack.c.bf16 %v237_v13, %v236_v12  ;;  %v826_v17 = vpack.c.bf16 %v239_v16, %v238_v14  ;;  %v240_v18 = vld [vmem:[#allocation8 + $0x20] sm:$0xff]  ;;  %v235_v22 = vld [vmem:[%s1299_s6 + $0x48] sm:$0xff]  ;;  %v242_v24 = vld [vmem:[#allocation8 + $0x30] sm:$0xff]  ;;  %p1015_p10 = scmp.ne.s32.totalorder %s1353_s19, %s1014_s16  ;;  %s1095_s9 = smov [#allocation9]  }
  0x79   : > { %v234_v21 = vld [vmem:[%s1299_s6 + $0x40] sm:$0xff]  ;;  %v830_v23 = vpack.c.bf16 %v241_v19, %v240_v18  ;;  %v243_v25 = vld [vmem:[#allocation8 + $0x38] sm:$0xff]  ;;  %v219_v28 = vld [vmem:[#allocation3 + $0x8] sm:$0xff]  ;;  %s1018_s30 = sshll.u32 %s1095_s9, 4  ;;  %s1019_s30 = int_to_ptr.vmem [resolvable:$false] %s1018_s30 }
  0x7a   : > { %823 = vmatprep.subr.bf16.mxu1 %v822_v15  ;;  %v818_v26 = vpack.c.bf16 %v235_v22, %v234_v21  ;;  %v834_v27 = vpack.c.bf16 %v243_v25, %v242_v24  ;;  %v220_v29 = vld [vmem:[#allocation3 + $0x10] sm:$0xff]  ;;  %v221_v30 = vld [vmem:[#allocation3 + $0x18] sm:$0xff]  ;;  %v222_v31 = vld [vmem:[#allocation3 + $0x20] sm:$0xff]  ;;  %p1016_p4 = pnand %p1015_p10, %p1429_p1  ;;  %s1020_s7 = scalar_lea.vmem %s1019_s30, 2048 }
  0x7b   : > { %809 = vmatpush3.bf16.msra.mxu0 %v806_v5  ;;  %825 = vmatpush3.bf16.msra.mxu1 %v822_v15  ;;  %v223_v32 = vld [vmem:[#allocation3 + $0x28] sm:$0xff]  ;;  %v224_v33 = vld [vmem:[#allocation3 + $0x30] sm:$0xff]  ;;  %v225_v34 = vld [vmem:[#allocation3 + $0x38] sm:$0xff]  ;;  %p1021_p2 = scmp.lt.s32.totalorder %s1353_s19, %s1019_s30  ;;  %p1022_p5 = scmp.lt.s32.totalorder %s1020_s7, %s1014_s16 }
  0x7c   : > { %811 = vmatprep.subr.bf16.mxu0 %v810_v9  ;;  %827 = vmatprep.subr.bf16.mxu1 %v826_v17  ;;  %v244_v35 = vld [vmem:[#allocation8 + $0x40] sm:$0xff]  ;;  %v245_v36 = vld [vmem:[#allocation8 + $0x48] sm:$0xff]  ;;  %v246_v38 = vld [vmem:[#allocation8 + $0x50] sm:$0xff]  ;;  %p1017_p0 = pneg %p1016_p4 }
  0x7d   : > { %v838_v37 = vpack.c.bf16 %v245_v36, %v244_v35  ;;  %v247_v39 = vld [vmem:[#allocation8 + $0x58] sm:$0xff]  ;;  %p1023_p11 = por %p1022_p5, %p1021_p2 }
  0x7e   : > { %v842_v40 = vpack.c.bf16 %v247_v39, %v246_v38 }
  0x7f   : > { %813 = vmatpush3.bf16.msra.mxu0 %v810_v9  ;;  %829 = vmatpush3.bf16.msra.mxu1 %v826_v17  ;;  %p1024_p12 = pnand %p1023_p11, %p1017_p0 }
  0x80   : > { %815 = vmatprep.subr.bf16.mxu0 %v814_v20  ;;  %831 = vmatprep.subr.bf16.mxu1 %v830_v23 }
  0x83   : > { %817 = vmatpush3.bf16.msra.mxu0 %v814_v20  ;;  %833 = vmatpush3.bf16.msra.mxu1 %v830_v23 }
  0x84   : > { %819 = vmatprep.subr.bf16.mxu0 %v818_v26  ;;  %835 = vmatprep.subr.bf16.mxu1 %v834_v27 }
  0x87   : > { %821 = vmatpush3.bf16.msra.mxu0 %v818_v26  ;;  %837 = vmatpush3.bf16.msra.mxu1 %v834_v27 }
  0x88   : > { %839 = vmatprep.subr.bf16.mxu1 %v838_v37 }
  0x8a   : > { %755 = vmatmul.mubr.msk.f32.vlgmr.msra.gmra.mrb[0].mxu0 %vm248_vm0, %v219_v28 }
  0x8b   : > { %757 = vmatprep.mubr.msk.f32.mxu0 %vm248_vm0, %v220_v29  ;;  %841 = vmatpush3.bf16.msra.mxu1 %v838_v37 }
  0x8c   : > { %843 = vmatprep.subr.bf16.mxu1 %v842_v40 }
  0x8e   : > { %758 = vmatmul.mubr.msk.f32.gmra.mrb[2].mxu0 %vm248_vm0, %v221_v30 }
  0x8f   : > { %760 = vmatprep.mubr.msk.f32.mxu0 %vm248_vm0, %v222_v31  ;;  %845 = vmatpush3.bf16.msra.mxu1 %v842_v40 }
  0x92   : > { %761 = vmatmul.mubr.msk.f32.gmra.mrb[4].mxu0 %vm248_vm0, %v223_v32 }
  0x93   : > { %763 = vmatprep.mubr.msk.f32.mxu0 %vm248_vm0, %v224_v33 }
  0x96   : > { %764 = vmatmul.mubr.msk.f32.gmra.mrb[6].mxu0 %vm248_vm0, %v225_v34 }
 0x15d   : > { %v756_v41 = vpop.f32.mrb[0].mxu0 }
 0x15e   : > { %380 = vst.msk [vmem:[#allocation2 + $0x8] sm:$0xff] %vm378_vm1, %v756_v41  ;;  %v339_v42 = vpop.f32.mrb[1].mxu0 }
 0x15f   : > { %379 = vst.msk [vmem:[#allocation2] sm:$0xff] %vm378_vm1, %v339_v42 }
 0x161   : > { %v759_v43 = vpop.f32.mrb[2].mxu0 }
 0x162   : > { %382 = vst.msk [vmem:[#allocation2 + $0x18] sm:$0xff] %vm378_vm1, %v759_v43  ;;  %v349_v44 = vpop.f32.mrb[3].mxu0 }
 0x163   : > { %381 = vst.msk [vmem:[#allocation2 + $0x10] sm:$0xff] %vm378_vm1, %v349_v44 }
 0x165   : > { %v762_v45 = vpop.f32.mrb[4].mxu0  ;;  %v388_v48 = vld [vmem:[#allocation2 + $0x8] sm:$0xff] }
 0x166   : > { %384 = vst.msk [vmem:[#allocation2 + $0x28] sm:$0xff] %vm378_vm1, %v762_v45  ;;  %v359_v46 = vpop.f32.mrb[5].mxu0  ;;  %v387_v47 = vld [vmem:[#allocation2] sm:$0xff] }
 0x167   : > { %383 = vst.msk [vmem:[#allocation2 + $0x20] sm:$0xff] %vm378_vm1, %v359_v46  ;;  %790 = vmatprep.mubr.msk.f32.mxu1 %vm378_vm1, %v387_v47 }
 0x168   : > { %791 = vmatmul.mubr.msk.f32.vlgmr.msra.gmra.mrb[0].mxu1 %vm378_vm1, %v388_v48 }
 0x169   : > { %v765_v49 = vpop.f32.mrb[6].mxu0  ;;  %v390_v52 = vld [vmem:[#allocation2 + $0x18] sm:$0xff] }
 0x16a   : > { %386 = vst.msk [vmem:[#allocation2 + $0x38] sm:$0xff] %vm378_vm1, %v765_v49  ;;  %v369_v50 = vpop.f32.mrb[7].mxu0  ;;  %v389_v51 = vld [vmem:[#allocation2 + $0x10] sm:$0xff] }
 0x16b   : > { %385 = vst.msk [vmem:[#allocation2 + $0x30] sm:$0xff] %vm378_vm1, %v369_v50  ;;  %793 = vmatprep.mubr.msk.f32.mxu1 %vm378_vm1, %v389_v51 }
 0x16c   : > { %794 = vmatmul.mubr.msk.f32.gmra.mrb[2].mxu1 %vm378_vm1, %v390_v52 }
 0x16d   : > { %v392_v54 = vld [vmem:[#allocation2 + $0x28] sm:$0xff] }
 0x16e   : > { %v391_v53 = vld [vmem:[#allocation2 + $0x20] sm:$0xff] }
 0x16f   : > { %796 = vmatprep.mubr.msk.f32.mxu1 %vm378_vm1, %v391_v53 }
 0x170   : > { %797 = vmatmul.mubr.msk.f32.gmra.mrb[4].mxu1 %vm378_vm1, %v392_v54 }
 0x171   : > { %v394_v56 = vld [vmem:[#allocation2 + $0x38] sm:$0xff] }
 0x172   : > { %v393_v55 = vld [vmem:[#allocation2 + $0x30] sm:$0xff] }
 0x173   : > { %799 = vmatprep.mubr.msk.f32.mxu1 %vm378_vm1, %v393_v55 }
 0x174   : > { %800 = vmatmul.mubr.msk.f32.gmra.mrb[6].mxu1 %vm378_vm1, %v394_v56 }
 0x23b   : > { %v792_v57 = vpop.f32.mrb[0].mxu1 }
 0x23c   : > { %v850_v58 = vround.rtne.f32 %v792_v57  ;;  %v485_v59 = vpop.f32.mrb[1].mxu1 }
 0x23d   : > { %v849_v60 = vround.rtne.f32 %v485_v59 }
 0x23e   : > { %v533_v61 = vmax.f32 %v850_v58, 0.0 }
 0x23f   : > { %v532_v62 = vmax.f32 %v849_v60, 0.0  ;;  %v795_v63 = vpop.f32.mrb[2].mxu1 }
 0x240   : > { %v541_v0 = vmin.f32 %v533_v61, 255.0  ;;  %v852_v1 = vround.rtne.f32 %v795_v63  ;;  %v495_v2 = vpop.f32.mrb[3].mxu1 }
 0x241   : > { %v540_v3 = vmin.f32 %v532_v62, 255.0  ;;  %v851_v4 = vround.rtne.f32 %v495_v2 }
 0x242   : > { %549 = vst [vmem:[%s1344_s26 + $0x8] sm:$0xff] %v541_v0  ;;  %v535_v5 = vmax.f32 %v852_v1, 0.0 }
 0x243   : > { %548 = vst [vmem:[%s1344_s26] sm:$0xff] %v540_v3  ;;  %v534_v6 = vmax.f32 %v851_v4, 0.0  ;;  %v798_v7 = vpop.f32.mrb[4].mxu1 }
 0x244   : > { %v543_v8 = vmin.f32 %v535_v5, 255.0  ;;  %v854_v9 = vround.rtne.f32 %v798_v7  ;;  %v505_v10 = vpop.f32.mrb[5].mxu1 }
 0x245   : > { %v542_v11 = vmin.f32 %v534_v6, 255.0  ;;  %v853_v12 = vround.rtne.f32 %v505_v10 }
 0x246   : > { %551 = vst [vmem:[%s1344_s26 + $0x18] sm:$0xff] %v543_v8  ;;  %v537_v13 = vmax.f32 %v854_v9, 0.0 }
 0x247   : > { %550 = vst [vmem:[%s1344_s26 + $0x10] sm:$0xff] %v542_v11  ;;  %v536_v14 = vmax.f32 %v853_v12, 0.0  ;;  %v801_v15 = vpop.f32.mrb[6].mxu1 }
 0x248   : > { %v545_v16 = vmin.f32 %v537_v13, 255.0  ;;  %v856_v17 = vround.rtne.f32 %v801_v15  ;;  %v515_v18 = vpop.f32.mrb[7].mxu1 }
 0x249   : > { %v544_v19 = vmin.f32 %v536_v14, 255.0  ;;  %v855_v20 = vround.rtne.f32 %v515_v18 }
 0x24a   : > { %553 = vst [vmem:[%s1344_s26 + $0x28] sm:$0xff] %v545_v16  ;;  %v539_v21 = vmax.f32 %v856_v17, 0.0 }
 0x24b   : > { %552 = vst [vmem:[%s1344_s26 + $0x20] sm:$0xff] %v544_v19  ;;  %v538_v22 = vmax.f32 %v855_v20, 0.0 }
 0x24c   : > { %v547_v23 = vmin.f32 %v539_v21, 255.0 }
 0x24d   : > { %v546_v24 = vmin.f32 %v538_v22, 255.0 }
 0x24e   : > { %555 = vst [vmem:[%s1344_s26 + $0x38] sm:$0xff] %v547_v23 }
 0x24f   : > { %554 = vst [vmem:[%s1344_s26 + $0x30] sm:$0xff] %v546_v24 }
 0x250   : > { %1027 = shalt.err (!%p1024_p12)
}
 0x251   : > { %s1028_s10 = scalar_lea.hbm %s1359_s11, 1024  ;;  %s1032_s17 = scalar_lea.hbm %s1407_s3, 4096 }
 0x252   : > { %p1029_p3 = scmp.ne.s32.totalorder %s1359_s11, %s1028_s10  ;;  %p1033_p7 = scmp.lt.u32.totalorder %s1359_s11, %s1407_s3 }
 0x253   : > { %p1034_p8 = scmp.lt.u32.totalorder %s1032_s17, %s1028_s10  ;;  %p1036_p10 = scmp.lt.u32.totalorder %s1028_s10, %s1359_s11 }
 0x254   : > { %p1030_p6 = pnand %p1029_p3, %p1429_p1 }
 0x255   : > { %p1035_p9 = por %p1034_p8, %p1033_p7 }
 0x256   : > { %p1031_p13 = pneg %p1030_p6 }
 0x257   : > { %p1037_p4 = por %p1036_p10, %p1035_p9 }
 0x259   : > { %p1038_p0 = pnand %p1037_p4, %p1031_p13 }
 0x25b   : > { %1041 = shalt.err (!%p1038_p0)
}
 0x25c   : > { %s1096_s23 = smov 128   ;;  %s1097_s26 = smov 8  }
 0x25d   : > { %867 = dma.vmem_to_hbm [thread:$0]  (%p1429_p1), %s1353_s19, 1024, %s1359_s11, %s557_s8, %s1096_s23, %s1096_s23, %s1097_s26  }
 0x25e PF: > { %p889_p2 = scmp.ge.s32.totalorder %s1088_s15, 2  ;;  %s585_s20 = sand.u32 1, %s1076_s12  }
 0x25f   : > { %p1430_p5 = scmp.ne.s32.totalorder %s1416_s25, 0  ;;  %s586_s29 = scalar_lea.sflag [#allocation5], %s585_s20 }
 0x261   : > { %p881_p11 = pnand %p889_p2, %p1430_p5 }
 0x263   : > { %1071 = dma.done.wait (!%p881_p11), %s586_s29, 1024  }
 0x264   : > { %1073 = vsyncadd (!%p881_p11), %s586_s29, 4294966272  ;;  %p17_p12 = scmp.ge.s32.totalorder %s1143_s18, 6   ;;  %s1431_s12 = smov %s1080_s13 }
 0x265   : > { %s1432_s13 = smov %s1084_s14  ;;  %s1433_s14 = smov %s1155_s21 }
 0x266   : > { %s1434_s15 = smov %s1143_s18  ;;  %19 = sbr.rel (!%p17_p12) target bundleno = 6 (0x6), region = 86 }
 0x26d   :  { %591 = vsyncpa [#allocation4], 1 }
 0x26e   :  { %593 = vsyncpa [#allocation4 + $0x1], 1 }
 0x26f   :  { %594 = vsyncpa [#allocation7], 1 }
 0x270   :  { %596 = vsyncpa [#allocation7 + $0x1], 1 }
 0x271   :  { %597 = vsyncpa [#allocation5], 1 }
 0x272   :  { %599 = vsyncpa [#allocation5 + $0x1], 1 }

</bundles_post_ra>
